<compile_context>
chip_gen: v7x
topology: tpu7x:2x2x1
jax: 0.10.0
libtpu: 0.0.40
codegen_flags: <defaults>
</compile_context>

<pallas_src>
import functools

import jax
import jax.numpy as jnp
from jax.experimental import pallas as pl
from jax.experimental.pallas import tpu as pltpu


def _round_up(x, m):
    return ((x + m - 1) // m) * m


def _vmem_limit_bytes():
    """Per-generation VMEM budget: ~85% of physical capacity (compiler headroom)."""
    try:
        cap = int(pltpu.get_tpu_info().vmem_capacity_bytes)
    except Exception:
        cap = 128 * 1024 * 1024          # v5e/v6e physical; conservative fallback
    return max(32 * 1024 * 1024, int(cap * 0.85))


def _const_spec(block_shape):
    """BlockSpec for a grid-constant operand: VMEM-resident, single-buffered."""
    try:
        return pl.BlockSpec(block_shape, lambda i: (0, 0), pipeline_mode=pl.Buffered(1))
    except Exception:
        # Runtime without pipeline_mode support: fall back to default double-buffering.
        return pl.BlockSpec(block_shape, lambda i: (0, 0))


def _pick_tm(batch, f_pad, h_pad, tm_max, vmem_budget):
    """Batch-tile rows: multiple of 16, >=2 grid steps when the batch allows (v7x megacore),
    shrunk until the resident VMEM footprint fits the per-generation budget."""
    tm = min(tm_max, _round_up(batch, 16))
    if batch > 32 and _round_up(batch, tm) // tm < 2:
        tm = _round_up(-(-batch // 2), 16)          # ~batch/2 -> two parallel grid steps

    weights = 2 * f_pad * h_pad * 2                  # both bf16 weights, single-buffered
    biases = (f_pad + h_pad) * 4

    def footprint(t):
        x_buf = 2 * t * f_pad * 4                    # f32 input tile, double-buffered
        o_buf = 2 * t * f_pad * 4                    # f32 output tile, double-buffered
        live = 2 * t * max(f_pad, h_pad) * 4         # in-kernel f32 intermediates (rough)
        return weights + biases + x_buf + o_buf + live

    while tm > 16 and footprint(tm) > vmem_budget:
        tm = _round_up(tm // 2, 16)
    return tm


def autoencoder_kernel(x_ref, w_enc_ref, b_enc_ref, w_dec_ref, b_dec_ref, out_ref):
    """One batch tile of the fused autoencoder forward.

    x_ref     : [TM, Fp]  input rows, f32 (cast to bf16 in-kernel)
    w_enc_ref : [Fp, Hp]  encoder weight, pre-transposed, bf16
    b_enc_ref : [1,  Hp]  encoder bias, f32
    w_dec_ref : [Hp, Fp]  decoder weight, pre-transposed, bf16
    b_dec_ref : [1,  Fp]  decoder bias, f32
    out_ref   : [TM, Fp]  reconstruction, f32
    """
    x = x_ref[...].astype(w_enc_ref.dtype)           # bf16 onto the MXU; no HBM bf16 copy

    # encoded = relu(x @ W_enc.T + b_enc)  -- W_enc.T already materialized => NN matmul.
    h = jnp.dot(x, w_enc_ref[...], preferred_element_type=jnp.float32)
    h = jnp.maximum(h + b_enc_ref[...], 0.0)         # f32 epilogue (v5e-safe)
    h = h.astype(w_dec_ref.dtype)

    # reconstructed = relu(h @ W_dec.T + b_dec)
    y = jnp.dot(h, w_dec_ref[...], preferred_element_type=jnp.float32)
    y = jnp.maximum(y + b_dec_ref[...], 0.0)

    out_ref[...] = y.astype(out_ref.dtype)


def prepare_params(w_enc, b_enc, w_dec, b_dec):
    """One-time parameter prep (NOT per forward call): pad to lane-dense multiples of 128,
    cast weights to bf16, and pre-transpose to the NN matmul layout.

    Zero-padding is exact: padded input columns are zero, padded hidden units get zero
    weight and bias (relu(0)=0), padded output features are sliced off in the wrapper.
    """
    H, F = w_enc.shape
    F_pad = _round_up(F, 128)
    H_pad = _round_up(H, 128)
    cdt = jnp.bfloat16
    w_enc_t = jnp.zeros((F_pad, H_pad), cdt).at[:F, :H].set(w_enc.T.astype(cdt))
    w_dec_t = jnp.zeros((H_pad, F_pad), cdt).at[:H, :F].set(w_dec.T.astype(cdt))
    b_enc_p = jnp.zeros((1, H_pad), jnp.float32).at[0, :H].set(b_enc.astype(jnp.float32))
    b_dec_p = jnp.zeros((1, F_pad), jnp.float32).at[0, :F].set(b_dec.astype(jnp.float32))
    return w_enc_t, b_enc_p, w_dec_t, b_dec_p


@functools.partial(jax.jit, static_argnames=("tm",))
def autoencoder_forward(x, w_enc_t, b_enc_p, w_dec_t, b_dec_p, *, tm=512):
    """x: [B, F] f32; prepared params from prepare_params(). Returns [B, F] f32."""
    B, F = x.shape
    F_pad, H_pad = w_enc_t.shape

    vmem_budget = _vmem_limit_bytes()
    TM = _pick_tm(B, F_pad, H_pad, tm, vmem_budget)
    B_pad = _round_up(B, TM)

    # Only x needs per-call padding (f32; bf16 cast happens inside the kernel). This runs
    # under jit so the pad and the final slice fuse with surrounding ops.
    x_p = jnp.zeros((B_pad, F_pad), x.dtype).at[:B, :F].set(x)

    grid = (B_pad // TM,)
    out_p = pl.pallas_call(
        autoencoder_kernel,
        out_shape=jax.ShapeDtypeStruct((B_pad, F_pad), x.dtype),
        grid_spec=pltpu.PrefetchScalarGridSpec(
            num_scalar_prefetch=0,
            grid=grid,
            in_specs=[
                pl.BlockSpec((TM, F_pad), lambda i: (i, 0)),   # x tile per grid step
                _const_spec((F_pad, H_pad)),                   # W_enc.T, VMEM-resident
                _const_spec((1, H_pad)),                       # b_enc
                _const_spec((H_pad, F_pad)),                   # W_dec.T, VMEM-resident
                _const_spec((1, F_pad)),                       # b_dec
            ],
            out_specs=pl.BlockSpec((TM, F_pad), lambda i: (i, 0)),
        ),
        compiler_params=pltpu.CompilerParams(
            dimension_semantics=("parallel",),     # batch axis shards across TCs (v7x)
            vmem_limit_bytes=vmem_budget),
    )(x_p, w_enc_t, b_enc_p, w_dec_t, b_dec_p)

    return out_p[:B, :F]


def init_linear_params(key, out_features, in_features):
    """PyTorch-style Kaiming-uniform init: U(-1/sqrt(fan_in), 1/sqrt(fan_in))."""
    k_w, k_b = jax.random.split(key)
    bound = 1.0 / jnp.sqrt(jnp.float32(in_features))
    w = jax.random.uniform(k_w, (out_features, in_features), jnp.float32, -bound, bound)
    b = jax.random.uniform(k_b, (out_features,), jnp.float32, -bound, bound)
    return w, b


if __name__ == "__main__":
    batch = 8
    input_shape = 64     # kwargs['input_shape']
    hid_units = 32       # kwargs['hid_units']

    key = jax.random.PRNGKey(0)
    k_x, k_enc, k_dec = jax.random.split(key, 3)

    x = jax.random.normal(k_x, (batch, input_shape), jnp.float32)
    w_enc, b_enc = init_linear_params(k_enc, hid_units, input_shape)
    w_dec, b_dec = init_linear_params(k_dec, input_shape, hid_units)

    params = prepare_params(w_enc, b_enc, w_dec, b_dec)   # one-time pad/cast/transpose
    out = autoencoder_forward(x, *params)
    out = jax.block_until_ready(out)

    # Pure-JAX f32 reference (bf16 MXU path -> loosened tolerance).
    # Final ReLU (not sigmoid) matches the active PyTorch forward: torch.relu(decoded).
    ref_h = jnp.maximum(x @ w_enc.T + b_enc, 0.0)
    ref_y = jnp.maximum(ref_h @ w_dec.T + b_dec, 0.0)
    assert out.shape == (batch, input_shape)
    assert jnp.allclose(out, ref_y, atol=5e-2, rtol=5e-2), "mismatch vs reference"

    print("KERNEL_OK")
</pallas_src>

<mosaic_0001>
module attributes {stable_mosaic.version = 11 : i64} {
  func.func @autoencoder_kernel(%arg0: i32, %arg1: memref<16x128xf32, #tpu.memory_space<vmem>>, %arg2: memref<128x128xbf16, #tpu.memory_space<vmem>>, %arg3: memref<1x128xf32, #tpu.memory_space<vmem>>, %arg4: memref<128x128xbf16, #tpu.memory_space<vmem>>, %arg5: memref<1x128xf32, #tpu.memory_space<vmem>>, %arg6: memref<16x128xf32, #tpu.memory_space<vmem>>) attributes {dimension_semantics = [#tpu.dimension_semantics<parallel>], iteration_bounds = array<i64: 1>, scalar_prefetch = 0 : i64, scratch_operands = 0 : i64, tpu.core_type = #tpu.core_type<tc>, window_params = [{transform_indices = @transform_0, window_bounds = array<i64: 16, 128>}, {pipeline_mode = #tpu.pipeline_mode<synchronous>, transform_indices = @transform_1, window_bounds = array<i64: 128, 128>}, {pipeline_mode = #tpu.pipeline_mode<synchronous>, transform_indices = @transform_2, window_bounds = array<i64: 1, 128>}, {pipeline_mode = #tpu.pipeline_mode<synchronous>, transform_indices = @transform_3, window_bounds = array<i64: 128, 128>}, {pipeline_mode = #tpu.pipeline_mode<synchronous>, transform_indices = @transform_4, window_bounds = array<i64: 1, 128>}, {transform_indices = @transform_5, window_bounds = array<i64: 16, 128>}]} {
    %c0 = arith.constant 0 : index
    %c0_0 = arith.constant 0 : index
    %0 = vector.load %arg1[%c0, %c0_0] : memref<16x128xf32, #tpu.memory_space<vmem>>, vector<16x128xf32>
    %1 = arith.truncf %0 : vector<16x128xf32> to vector<16x128xbf16>
    %c0_1 = arith.constant 0 : index
    %c0_2 = arith.constant 0 : index
    %2 = vector.load %arg2[%c0_1, %c0_2] : memref<128x128xbf16, #tpu.memory_space<vmem>>, vector<128x128xbf16>
    %cst = arith.constant dense<0.000000e+00> : vector<16x128xf32>
    %3 = tpu.matmul %1, %2, %cst {dimension_numbers = #tpu.dot_dimension_numbers<[1], [0], [0], [1], [0, 0, 1, 1], [], []>} : vector<16x128xbf16>, vector<128x128xbf16>, vector<16x128xf32> -> vector<16x128xf32>
    %c0_3 = arith.constant 0 : index
    %c0_4 = arith.constant 0 : index
    %4 = vector.load %arg3[%c0_3, %c0_4] : memref<1x128xf32, #tpu.memory_space<vmem>>, vector<1x128xf32>
    %5 = vector.broadcast %4 : vector<1x128xf32> to vector<16x128xf32>
    %6 = arith.addf %3, %5 : vector<16x128xf32>
    %cst_5 = arith.constant 0.000000e+00 : f32
    %7 = vector.broadcast %cst_5 : f32 to vector<16x128xf32>
    %8 = arith.maximumf %6, %7 : vector<16x128xf32>
    %9 = arith.truncf %8 : vector<16x128xf32> to vector<16x128xbf16>
    %c0_6 = arith.constant 0 : index
    %c0_7 = arith.constant 0 : index
    %10 = vector.load %arg4[%c0_6, %c0_7] : memref<128x128xbf16, #tpu.memory_space<vmem>>, vector<128x128xbf16>
    %cst_8 = arith.constant dense<0.000000e+00> : vector<16x128xf32>
    %11 = tpu.matmul %9, %10, %cst_8 {dimension_numbers = #tpu.dot_dimension_numbers<[1], [0], [0], [1], [0, 0, 1, 1], [], []>} : vector<16x128xbf16>, vector<128x128xbf16>, vector<16x128xf32> -> vector<16x128xf32>
    %c0_9 = arith.constant 0 : index
    %c0_10 = arith.constant 0 : index
    %12 = vector.load %arg5[%c0_9, %c0_10] : memref<1x128xf32, #tpu.memory_space<vmem>>, vector<1x128xf32>
    %13 = vector.broadcast %12 : vector<1x128xf32> to vector<16x128xf32>
    %14 = arith.addf %11, %13 : vector<16x128xf32>
    %cst_11 = arith.constant 0.000000e+00 : f32
    %15 = vector.broadcast %cst_11 : f32 to vector<16x128xf32>
    %16 = arith.maximumf %14, %15 : vector<16x128xf32>
    %c0_12 = arith.constant 0 : index
    %c0_13 = arith.constant 0 : index
    %17 = vector.load %arg6[%c0_12, %c0_13] : memref<16x128xf32, #tpu.memory_space<vmem>>, vector<16x128xf32>
    tpu.vector_store %arg6[%c0_12, %c0_13], %16 {strides = array<i32>} : memref<16x128xf32, #tpu.memory_space<vmem>>, vector<16x128xf32>,
    return
  }
  func.func @transform_0(%arg0: i32) -> (i32, i32) {
    %c0_i32 = arith.constant 0 : i32
    %c0_i32_0 = arith.constant 0 : i32
    return %arg0, %c0_i32 : i32, i32
  }
  func.func @transform_1(%arg0: i32) -> (i32, i32) {
    %c0_i32 = arith.constant 0 : i32
    %c0_i32_0 = arith.constant 0 : i32
    %c0_i32_1 = arith.constant 0 : i32
    return %c0_i32, %c0_i32_0 : i32, i32
  }
  func.func @transform_2(%arg0: i32) -> (i32, i32) {
    %c0_i32 = arith.constant 0 : i32
    %c0_i32_0 = arith.constant 0 : i32
    %c0_i32_1 = arith.constant 0 : i32
    return %c0_i32, %c0_i32_0 : i32, i32
  }
  func.func @transform_3(%arg0: i32) -> (i32, i32) {
    %c0_i32 = arith.constant 0 : i32
    %c0_i32_0 = arith.constant 0 : i32
    %c0_i32_1 = arith.constant 0 : i32
    return %c0_i32, %c0_i32_0 : i32, i32
  }
  func.func @transform_4(%arg0: i32) -> (i32, i32) {
    %c0_i32 = arith.constant 0 : i32
    %c0_i32_0 = arith.constant 0 : i32
    %c0_i32_1 = arith.constant 0 : i32
    return %c0_i32, %c0_i32_0 : i32, i32
  }
  func.func @transform_5(%arg0: i32) -> (i32, i32) {
    %c0_i32 = arith.constant 0 : i32
    %c0_i32_0 = arith.constant 0 : i32
    return %arg0, %c0_i32 : i32, i32
  }
}

</mosaic_0001>

<bundles_post_ra>
// kernel: autoencoder_forward.1
= control target key start
LH: loop header
LB: loop body
LE: loop exit
PB: predicated region body
PF: predicated region fallthrough
CT: control target
= control target key end

     0   :  { %10 = vsyncpa [#allocation3], 0  ;;  %s703_s0 = inlined_call_operand.hbm [shape: f32[16,128], index: 0, kind: input, shape index: {}]   ;;  %s704_s1 = inlined_call_operand.hbm [shape: bf16[128,128], index: 1, kind: input, shape index: {}]   ;;  %s705_s2 = inlined_call_operand.hbm [shape: f32[1,128], index: 2, kind: input, shape index: {}]   ;;  %s706_s3 = inlined_call_operand.hbm [shape: bf16[128,128], index: 3, kind: input, shape index: {}]   ;;  %s707_s4 = inlined_call_operand.hbm [shape: f32[1,128], index: 4, kind: input, shape index: {}]   ;;  %s708_s5 = inlined_call_operand.hbm [shape: f32[16,128], index: 5, kind: output, shape index: {}]  }
   0x1   :  { %11 = vsyncpa [#allocation6], 0 }
   0x2   :  { %12 = vsyncpa [#allocation9], 0 }
   0x3   :  { %13 = vsyncpa [#allocation4], 0  ;;  %s583_s18 = smov [#allocation5]   ;;  %s443_s22 = scalar_lea.hbm %s704_s1, 1024 }
   0x4   :  { %s31_s19 = sshll.u32 %s583_s18, 4  ;;  %p444_p0 = scmp.ne.s32.totalorder %s704_s1, %s443_s22  ;;  %s32_s19 = int_to_ptr.vmem [resolvable:$true] %s31_s19 }
   0x5   :  { %p447_p1 = scmp.lt.u32.totalorder %s443_s22, %s704_s1 }
   0x7   :  { %p449_p2 = pnand %p447_p1, %p444_p0 }
   0x9   :  { %452 = shalt.err (!%p449_p2)
}
   0xa   :  { %s453_s27 = scalar_lea.vmem %s32_s19, 1024  ;;  %p458_p4 = scmp.lt.s32.totalorder %s32_s19, %s32_s19 }
   0xb   :  { %p454_p3 = scmp.ne.s32.totalorder %s32_s19, %s453_s27  ;;  %p459_p5 = scmp.lt.s32.totalorder %s453_s27, %s453_s27 }
   0xd   :  { %p460_p6 = por %p459_p5, %p458_p4 }
   0xf   :  { %p461_p7 = pnand %p460_p6, %p454_p3 }
  0x11   :  { %464 = shalt.err (!%p461_p7)
}
  0x12   :  { %s584_s28 = smov 64   ;;  %s585_s29 = smov 4  }
  0x13   :  { %37 = dma.hbm_to_vmem [thread:$0]  %s704_s1, 1024, %s32_s19, [#allocation6], %s584_s28, %s584_s28, %s585_s29  }
  0x14   :  { %s586_s7 = smov [#allocation8]   ;;  %s587_s9 = smov [#allocation2]  }
  0x15   :  { %s53_s8 = sshll.u32 %s586_s7, 4  ;;  %s19_s10 = sshll.u32 %s587_s9, 4  ;;  %s54_s8 = int_to_ptr.vmem [resolvable:$true] %s53_s8  ;;  %s20_s10 = int_to_ptr.vmem [resolvable:$true] %s19_s10 }
  0x16   :  { %s465_s13 = scalar_lea.hbm %s706_s3, 1024 }
  0x17   :  { %p466_p8 = scmp.ne.s32.totalorder %s706_s3, %s465_s13  ;;  %p469_p9 = scmp.lt.u32.totalorder %s465_s13, %s706_s3 }
  0x19   :  { %p471_p10 = pnand %p469_p9, %p466_p8 }
  0x1b   :  { %474 = shalt.err (!%p471_p10)
}
  0x1c   :  { %s475_s1 = scalar_lea.vmem %s54_s8, 1024  ;;  %p480_p12 = scmp.lt.s32.totalorder %s54_s8, %s54_s8 }
  0x1d   :  { %p476_p11 = scmp.ne.s32.totalorder %s54_s8, %s475_s1  ;;  %p481_p13 = scmp.lt.s32.totalorder %s475_s1, %s475_s1 }
  0x1f   :  { %p482_p0 = por %p481_p13, %p480_p12 }
  0x21   :  { %p483_p1 = pnand %p482_p0, %p476_p11 }
  0x23   :  { %486 = shalt.err (!%p483_p1)
}
  0x24   :  { %59 = dma.hbm_to_vmem [thread:$0]  %s706_s3, 1024, %s54_s8, [#allocation9], %s584_s28, %s584_s28, %s585_s29  }
  0x25   :  { %s487_s22 = scalar_lea.hbm %s703_s0, 256 }
  0x26   :  { %p488_p2 = scmp.ne.s32.totalorder %s703_s0, %s487_s22  ;;  %p491_p3 = scmp.lt.u32.totalorder %s487_s22, %s703_s0 }
  0x28   :  { %p493_p4 = pnand %p491_p3, %p488_p2 }
  0x2a   :  { %496 = shalt.err (!%p493_p4)
}
  0x2b   :  { %s497_s27 = scalar_lea.vmem %s20_s10, 256  ;;  %p502_p6 = scmp.lt.s32.totalorder %s20_s10, %s20_s10 }
  0x2c   :  { %p498_p5 = scmp.ne.s32.totalorder %s20_s10, %s497_s27  ;;  %p503_p7 = scmp.lt.s32.totalorder %s497_s27, %s497_s27 }
  0x2e   :  { %p504_p8 = por %p503_p7, %p502_p6 }
  0x30   :  { %p505_p9 = pnand %p504_p8, %p498_p5 }
  0x32   :  { %508 = shalt.err (!%p505_p9)
}
  0x33   :  { %s588_s3 = smov 128   ;;  %s589_s28 = smov 8  }
  0x34   :  { %25 = dma.hbm_to_vmem [thread:$0]  %s703_s0, 256, %s20_s10, [#allocation3], %s588_s3, %s588_s3, %s589_s28  }
  0x35   :  { %s590_s6 = smov [#allocation7]   ;;  %s591_s8 = smov [#allocation10]  }
  0x36   :  { %s44_s7 = sshll.u32 %s590_s6, 4  ;;  %s66_s9 = sshll.u32 %s591_s8, 4  ;;  %s45_s7 = int_to_ptr.vmem [resolvable:$true] %s44_s7  ;;  %s67_s9 = int_to_ptr.vmem [resolvable:$true] %s66_s9 }
  0x37   :  { %s509_s13 = scalar_lea.hbm %s705_s2, 16 }
  0x38   :  { %p510_p10 = scmp.ne.s32.totalorder %s705_s2, %s509_s13  ;;  %p513_p11 = scmp.lt.u32.totalorder %s509_s13, %s705_s2 }
  0x3a   :  { %p515_p12 = pnand %p513_p11, %p510_p10 }
  0x3c   :  { %518 = shalt.err (!%p515_p12)
}
  0x3d   :  { %s519_s0 = scalar_lea.vmem %s45_s7, 16  ;;  %s523_s10 = scalar_lea.vmem %s45_s7, 32 }
  0x3e   :  { %p520_p13 = scmp.ne.s32.totalorder %s45_s7, %s519_s0  ;;  %p524_p0 = scmp.lt.s32.totalorder %s45_s7, %s45_s7 }
  0x3f   :  { %p525_p1 = scmp.lt.s32.totalorder %s523_s10, %s519_s0 }
  0x41   :  { %p526_p2 = por %p525_p1, %p524_p0 }
  0x43   :  { %p527_p3 = pnand %p526_p2, %p520_p13 }
  0x45   :  { %530 = shalt.err (!%p527_p3)
}
  0x46   :  { %47 = dma.hbm_to_vmem [thread:$0]  %s705_s2, 16, %s45_s7, [#allocation6]  }
  0x47   :  { %s531_s21 = scalar_lea.hbm %s707_s4, 16 }
  0x48   :  { %p532_p4 = scmp.ne.s32.totalorder %s707_s4, %s531_s21  ;;  %p535_p5 = scmp.lt.u32.totalorder %s531_s21, %s707_s4 }
  0x4a   :  { %p537_p6 = pnand %p535_p5, %p532_p4 }
  0x4c   :  { %540 = shalt.err (!%p537_p6)
}
  0x4d   :  { %s541_s26 = scalar_lea.vmem %s67_s9, 16  ;;  %s545_s27 = scalar_lea.vmem %s67_s9, 32 }
  0x4e   :  { %p542_p7 = scmp.ne.s32.totalorder %s67_s9, %s541_s26  ;;  %p546_p8 = scmp.lt.s32.totalorder %s67_s9, %s67_s9 }
  0x4f   :  { %p547_p9 = scmp.lt.s32.totalorder %s545_s27, %s541_s26 }
  0x51   :  { %p548_p10 = por %p547_p9, %p546_p8 }
  0x53   :  { %p549_p11 = pnand %p548_p10, %p542_p7 }
  0x55   :  { %552 = shalt.err (!%p549_p11)
}
  0x56   :  { %69 = dma.hbm_to_vmem [thread:$0]  %s707_s4, 16, %s67_s9, [#allocation9]  }
  0x57   :  { %575 = dma.done.wait [#allocation3], 256  }
  0x58   :  { %576 = vsyncadd [#allocation3], 4294967040 }
  0x59   :  { %577 = dma.done.wait [#allocation6], 1040  }
  0x5a   :  { %578 = vsyncadd [#allocation6], 4294966256 }
  0x5b   :  { %579 = dma.done.wait [#allocation9], 1040  }
  0x5c   :  { %580 = vsyncadd [#allocation9], 4294966256  ;;  %v592_v0 = vmov 0.0   ;;  %vm593_vm0 = vmmov 0   ;;  %v427_v1 = vld [vmem:[#allocation5] sm:$0xff]   ;;  %v428_v2 = vld [vmem:[#allocation5 + $0x8] sm:$0xff]  }
  0x5d   :  { %375 = vmatprep.subr.bf16.mxu0 %v592_v0  ;;  %391 = vmatprep.mubr.msk.bf16.mxu0 %vm593_vm0, %v592_v0  ;;  %v429_v3 = vld [vmem:[#allocation5 + $0x10] sm:$0xff]   ;;  %v435_v4 = vld [vmem:[#allocation8] sm:$0xff]   ;;  %v430_v5 = vld [vmem:[#allocation5 + $0x18] sm:$0xff]   ;;  %s594_s4 = smov [#allocation11]  }
  0x5e   :  { %395 = vmatprep.subr.bf16.mxu1 %v592_v0  ;;  %411 = vmatprep.mubr.msk.bf16.mxu1 %vm593_vm0, %v592_v0  ;;  %v436_v6 = vld [vmem:[#allocation8 + $0x8] sm:$0xff]   ;;  %v431_v7 = vld [vmem:[#allocation5 + $0x20] sm:$0xff]   ;;  %v437_v8 = vld [vmem:[#allocation8 + $0x10] sm:$0xff]   ;;  %s325_s30 = sshll.u32 %s594_s4, 4  ;;  %s326_s30 = int_to_ptr.vmem [resolvable:$true] %s325_s30 }
  0x5f   :  { %376 = vmatpush3.bf16.msra.mxu0 %v427_v1  ;;  %396 = vmatpush3.bf16.msra.mxu1 %v435_v4  ;;  %v432_v9 = vld [vmem:[#allocation5 + $0x28] sm:$0xff]   ;;  %v438_v10 = vld [vmem:[#allocation8 + $0x18] sm:$0xff]   ;;  %v433_v11 = vld [vmem:[#allocation5 + $0x30] sm:$0xff]   ;;  %s553_s6 = scalar_lea.vmem %s326_s30, 256  ;;  %p558_p13 = scmp.lt.s32.totalorder %s326_s30, %s326_s30 }
  0x60   :  { %377 = vmatprep.subr.bf16.mxu0 %v592_v0  ;;  %397 = vmatprep.subr.bf16.mxu1 %v592_v0  ;;  %v439_v12 = vld [vmem:[#allocation8 + $0x20] sm:$0xff]   ;;  %v434_v13 = vld [vmem:[#allocation5 + $0x38] sm:$0xff]   ;;  %v86_v14 = vld [vmem:[#allocation2] sm:$0xff]  ;;  %p554_p12 = scmp.ne.s32.totalorder %s326_s30, %s553_s6  ;;  %p559_p0 = scmp.lt.s32.totalorder %s553_s6, %s553_s6 }
  0x61   :  { %v87_v15 = vld [vmem:[#allocation2 + $0x8] sm:$0xff]  ;;  %v440_v16 = vld [vmem:[#allocation8 + $0x28] sm:$0xff]   ;;  %v339_v20 = vld [vmem:[#allocation7] ss:$0 sm:$0xff] }
  0x62   :  { %v88_v17 = vpack.c.bf16 %v87_v15, %v86_v14  ;;  %v441_v18 = vld [vmem:[#allocation8 + $0x30] sm:$0xff]   ;;  %v442_v19 = vld [vmem:[#allocation8 + $0x38] sm:$0xff]   ;;  %v348_v30 = vld [vmem:[#allocation10] ss:$0 sm:$0xff]  ;;  %p560_p1 = por %p559_p0, %p558_p13 }
  0x63   :  { %378 = vmatpush3.bf16.msra.mxu0 %v428_v2  ;;  %398 = vmatpush3.bf16.msra.mxu1 %v436_v6 }
  0x64   :  { %379 = vmatprep.subr.bf16.mxu0 %v592_v0  ;;  %399 = vmatprep.subr.bf16.mxu1 %v592_v0  ;;  %p561_p2 = pnand %p560_p1, %p554_p12 }
  0x67   :  { %380 = vmatpush3.bf16.msra.mxu0 %v429_v3  ;;  %400 = vmatpush3.bf16.msra.mxu1 %v437_v8 }
  0x68   :  { %381 = vmatprep.subr.bf16.mxu0 %v592_v0  ;;  %401 = vmatprep.subr.bf16.mxu1 %v592_v0 }
  0x6b   :  { %382 = vmatpush3.bf16.msra.mxu0 %v430_v5  ;;  %402 = vmatpush3.bf16.msra.mxu1 %v438_v10 }
  0x6c   :  { %383 = vmatprep.subr.bf16.mxu0 %v592_v0  ;;  %403 = vmatprep.subr.bf16.mxu1 %v592_v0 }
  0x6f   :  { %384 = vmatpush3.bf16.msra.mxu0 %v431_v7  ;;  %404 = vmatpush3.bf16.msra.mxu1 %v439_v12 }
  0x70   :  { %385 = vmatprep.subr.bf16.mxu0 %v592_v0  ;;  %405 = vmatprep.subr.bf16.mxu1 %v592_v0 }
  0x73   :  { %386 = vmatpush3.bf16.msra.mxu0 %v432_v9  ;;  %406 = vmatpush3.bf16.msra.mxu1 %v440_v16 }
  0x74   :  { %387 = vmatprep.subr.bf16.mxu0 %v592_v0  ;;  %407 = vmatprep.subr.bf16.mxu1 %v592_v0 }
  0x77   :  { %388 = vmatpush3.bf16.msra.mxu0 %v433_v11  ;;  %408 = vmatpush3.bf16.msra.mxu1 %v441_v18 }
  0x78   :  { %389 = vmatprep.subr.bf16.mxu0 %v592_v0  ;;  %409 = vmatprep.subr.bf16.mxu1 %v592_v0 }
  0x7b   :  { %390 = vmatpush3.bf16.msra.mxu0 %v434_v13  ;;  %410 = vmatpush3.bf16.msra.mxu1 %v442_v19 }
  0x7e   :  { %392 = vmatmul.mubr.bf16.vlgmr.msra.gmra.mrb[0].mxu0 %v88_v17 }
 0x151   :  { %v194_v21 = vpop.f32.mrb[0].mxu0 }
 0x152   :  { %v195_v22 = vadd.f32 %v339_v20, %v194_v21  ;;  %v393_v23 = vpop.f32.mrb[1].mxu0 }
 0x153   :  { %v197_v24 = vpop.f32.mrb[2].mxu0 }
 0x154   :  { %v198_v25 = vadd.f32 %v339_v20, %v197_v24  ;;  %v394_v26 = vpop.f32.mrb[3].mxu0  ;;  %v201_v27 = vmax.f32 %v195_v22, 0.0 }
 0x156   :  { %v202_v28 = vmax.f32 %v198_v25, 0.0 }
 0x158   :  { %v203_v29 = vpack.c.bf16 %v202_v28, %v201_v27 }
 0x15a   :  { %412 = vmatmul.mubr.bf16.vlgmr.msra.gmra.mrb[0].mxu1 %v203_v29 }
 0x22d   :  { %v309_v31 = vpop.f32.mrb[0].mxu1 }
 0x22e   :  { %v310_v32 = vadd.f32 %v348_v30, %v309_v31  ;;  %v413_v33 = vpop.f32.mrb[1].mxu1 }
 0x22f   :  { %v312_v34 = vpop.f32.mrb[2].mxu1 }
 0x230   :  { %v316_v35 = vmax.f32 %v310_v32, 0.0  ;;  %v313_v36 = vadd.f32 %v348_v30, %v312_v34  ;;  %v414_v37 = vpop.f32.mrb[3].mxu1 }
 0x232   :  { %318 = vst [vmem:[#allocation11] sm:$0xff] %v316_v35  ;;  %v317_v38 = vmax.f32 %v313_v36, 0.0 }
 0x234   :  { %319 = vst [vmem:[#allocation11 + $0x8] sm:$0xff] %v317_v38 }
 0x235   :  { %564 = shalt.err (!%p561_p2)
}
 0x236   :  { %s565_s9 = scalar_lea.hbm %s708_s5, 256 }
 0x237   :  { %p566_p3 = scmp.ne.s32.totalorder %s708_s5, %s565_s9  ;;  %p569_p4 = scmp.lt.u32.totalorder %s565_s9, %s708_s5 }
 0x239   :  { %p571_p5 = pnand %p569_p4, %p566_p3 }
 0x23b   :  { %574 = shalt.err (!%p571_p5)
}
 0x23c   :  { %331 = dma.vmem_to_hbm [thread:$0]  %s326_s30, 256, %s708_s5, [#allocation4], %s588_s3, %s588_s3, %s589_s28  }
 0x23d   :  { %581 = dma.done.wait [#allocation4], 256  }
 0x23e   :  { %582 = vsyncadd [#allocation4], 4294967040 }
 0x23f   :  { %335 = vsyncpa [#allocation3], 1 }
 0x240   :  { %336 = vsyncpa [#allocation6], 1 }
 0x241   :  { %337 = vsyncpa [#allocation9], 1 }
 0x242   :  { %338 = vsyncpa [#allocation4], 1 }

</bundles_post_ra>
